<compile_context>
chip_gen: v6e
topology: v6e:2x2x1
jax: 0.10.0
libtpu: 0.0.40
codegen_flags: <defaults>
</compile_context>

<pallas_src>
import math
import functools
import jax
import jax.numpy as jnp
from jax import lax
from jax.experimental import pallas as pl
from jax.experimental.pallas import tpu as pltpu


# ---------------------------------------------------------------------------
# Fused kernel: full decoder stack + final vocabulary projection
# ---------------------------------------------------------------------------
def _chats_stack_kernel(x_ref,                                  # (Bb, L, D) activation input
                        wqkv_ref, bqkv_ref,                     # (D, 3D), (1, 3D)   per layer
                        wo_ref, bo_ref,                         # (D, D),  (1, D)    per layer
                        g1_ref, be1_ref,                        # (1, D),  (1, D)    per layer
                        wl_ref, bl_ref,                         # (D, D),  (1, D)    per layer
                        g2_ref, be2_ref,                        # (1, D),  (1, D)    per layer
                        wout_ref, bout_ref,                     # (D, V),  (1, V)    grid-invariant
                        o_ref,                                  # (Bb, L, V) logits output
                        h_scr):                                 # VMEM (Bb, L, D) f32 carry
    layer = pl.program_id(1)
    n_layers = pl.num_programs(1)

    # Load the embedded/pos-encoded activation once per batch block.
    @pl.when(layer == 0)
    def _():
        h_scr[...] = x_ref[...].astype(jnp.float32)

    h = h_scr[...]                                              # (Bb, L, D) f32
    Bb, L, D = h.shape
    scale = 1.0 / math.sqrt(D)

    h2d = h.reshape(Bb * L, D)                                  # lane-dense row tile

    # ---- fused QKV projection: one (Bb*L, D) @ (D, 3D) matmul --------------
    qkv = jnp.dot(h2d, wqkv_ref[...], preferred_element_type=jnp.float32) + bqkv_ref[...]
    q = qkv[:, 0 * D:1 * D].reshape(Bb, L, D)
    k = qkv[:, 1 * D:2 * D].reshape(Bb, L, D)
    v = qkv[:, 2 * D:3 * D].reshape(Bb, L, D)

    # ---- scaled dot-product attention, causal mask (triu(diag=1) -> -inf) --
    # Contract on the feature dim directly; no materialized k.T.
    scores = lax.dot_general(q, k,
                             dimension_numbers=(((2,), (2,)), ((0,), (0,))),
                             preferred_element_type=jnp.float32) * scale   # (Bb, L, L)
    row = lax.broadcasted_iota(jnp.int32, (Bb, L, L), 1)
    col = lax.broadcasted_iota(jnp.int32, (Bb, L, L), 2)
    scores = jnp.where(col > row, -1e30, scores)

    m = jnp.max(scores, axis=-1, keepdims=True)
    p = jnp.exp(scores - m)
    inv_den = pl.reciprocal(jnp.sum(p, axis=-1, keepdims=True), approx=True)
    attn = p * inv_den

    ctx = lax.dot_general(attn, v,
                          dimension_numbers=(((2,), (1,)), ((0,), (0,))),
                          preferred_element_type=jnp.float32)   # (Bb, L, D)
    ctx2d = ctx.reshape(Bb * L, D)
    attn_out = jnp.dot(ctx2d, wo_ref[...], preferred_element_type=jnp.float32) + bo_ref[...]

    # ---- residual + LayerNorm 1 (single-pass variance) ---------------------
    r1 = h2d + attn_out
    mu1 = jnp.mean(r1, axis=-1, keepdims=True)
    var1 = jnp.mean(r1 * r1, axis=-1, keepdims=True) - mu1 * mu1
    n1 = (r1 - mu1) * lax.rsqrt(var1 + 1e-5) * g1_ref[...] + be1_ref[...]

    # ---- Linear(D, D) (linear_size=None -> no hidden/ReLU), residual + LN2 -
    mlp = jnp.dot(n1, wl_ref[...], preferred_element_type=jnp.float32) + bl_ref[...]
    r2 = n1 + mlp
    mu2 = jnp.mean(r2, axis=-1, keepdims=True)
    var2 = jnp.mean(r2 * r2, axis=-1, keepdims=True) - mu2 * mu2
    n2 = (r2 - mu2) * lax.rsqrt(var2 + 1e-5) * g2_ref[...] + be2_ref[...]

    h_scr[...] = n2.reshape(Bb, L, D)

    # ---- final vocabulary projection, only after the last decoder layer ----
    @pl.when(layer == n_layers - 1)
    def _():
        logits = jnp.dot(n2, wout_ref[...], preferred_element_type=jnp.float32) + bout_ref[...]
        o_ref[...] = logits.reshape(Bb, L, -1).astype(o_ref.dtype)


# ---------------------------------------------------------------------------
# pallas_call wrapper
# ---------------------------------------------------------------------------
def chats_stack(x, params, *, batch_block=None):
    """x: (B, L, D) embedded + pos-encoded activations. Returns (B, L, V) logits."""
    B, L, D = x.shape
    V = params["w_out"].shape[1]
    NL = params["w_qkv"].shape[0]

    bblk = B if batch_block is None else batch_block
    assert B % bblk == 0, "batch must be divisible by batch_block"
    grid = (B // bblk, NL)

    # Per-layer weight blocks: leading layer axis squeezed, indexed by grid axis 1.
    def lyr(shape):
        return pl.BlockSpec((None,) + shape, lambda b, l: (l, 0, 0))

    # Grid-invariant blocks (fetched once; index never changes).
    def const(shape):
        return pl.BlockSpec(shape, lambda b, l: (0, 0))

    act_in = pl.BlockSpec((bblk, L, D), lambda b, l: (b, 0, 0))
    act_out = pl.BlockSpec((bblk, L, V), lambda b, l: (b, 0, 0))

    return pl.pallas_call(
        _chats_stack_kernel,
        out_shape=jax.ShapeDtypeStruct((B, L, V), x.dtype),
        grid=grid,
        in_specs=[act_in,
                  lyr((D, 3 * D)), lyr((1, 3 * D)),   # w_qkv, b_qkv
                  lyr((D, D)), lyr((1, D)),           # w_o,  b_o
                  lyr((1, D)), lyr((1, D)),           # ln1 gamma, beta
                  lyr((D, D)), lyr((1, D)),           # w_l,  b_l
                  lyr((1, D)), lyr((1, D)),           # ln2 gamma, beta
                  const((D, V)), const((1, V))],      # w_out, b_out
        out_specs=act_out,
        scratch_shapes=[pltpu.VMEM((bblk, L, D), jnp.float32)],
        compiler_params=pltpu.CompilerParams(
            dimension_semantics=("parallel", "arbitrary")),
    )(x,
      params["w_qkv"], params["b_qkv"],
      params["w_o"], params["b_o"],
      params["g1"], params["be1"],
      params["w_l"], params["b_l"],
      params["g2"], params["be2"],
      params["w_out"], params["b_out"])


# ---------------------------------------------------------------------------
# Model glue: embedding, positional encoding, parameter init, forward
# ---------------------------------------------------------------------------
def positional_encoding(word_size, max_length):
    # Matches PostionalEncoding: sin(pos * exp(-ln(1e4)*(w - w%2)/D) + pi/2*(w%2))
    pos = jnp.arange(max_length, dtype=jnp.float32)[:, None]
    words = jnp.arange(word_size, dtype=jnp.float32)
    mod2 = words % 2.0
    offset = jnp.pi * 0.5 * mod2
    x = pos * jnp.exp(-math.log(10000.0) * (words - mod2) / word_size)
    return jnp.sin(x + offset)                       # (max_length, word_size)


def init_params(key, num_words, word_dims, num_decoders):
    D, V, NL = word_dims, num_words, num_decoders
    ks = jax.random.split(key, 7)
    params = {
        "embedding": jax.random.normal(ks[0], (V, D), jnp.float32) * 0.02,
        # Stacked per-layer weights (leading layer axis). Weights stored pre-
        # transposed so kernels compute y = x @ W + b.
        "w_qkv": jax.random.normal(ks[1], (NL, D, 3 * D), jnp.float32) * 0.02,
        "b_qkv": jnp.zeros((NL, 1, 3 * D), jnp.float32),
        "w_o": jax.random.normal(ks[2], (NL, D, D), jnp.float32) * 0.02,
        "b_o": jnp.zeros((NL, 1, D), jnp.float32),
        "g1": jnp.ones((NL, 1, D), jnp.float32),
        "be1": jnp.zeros((NL, 1, D), jnp.float32),
        "w_l": jax.random.normal(ks[3], (NL, D, D), jnp.float32) * 0.02,
        "b_l": jnp.zeros((NL, 1, D), jnp.float32),
        "g2": jnp.ones((NL, 1, D), jnp.float32),
        "be2": jnp.zeros((NL, 1, D), jnp.float32),
        # Final Linear(word_dims, num_words), pre-transposed (D, V).
        "w_out": jax.random.normal(ks[4], (D, V), jnp.float32) * 0.02,
        "b_out": jnp.zeros((1, V), jnp.float32),
    }
    return params


@functools.partial(jax.jit, static_argnames=())
def chats_forward(tokens, params, pos_enc):
    # tokens: (L, B) int32 (batch_first=False, as in the PyTorch module)
    L, B = tokens.shape
    x = params["embedding"][tokens]                  # (L, B, D) embedding gather (glue)
    x = x + pos_enc[:L][:, None, :]                  # positional encoding (glue)
    x = jnp.transpose(x, (1, 0, 2))                  # -> (B, L, D) kernel layout
    y = chats_stack(x, params)                       # fused decoder stack + vocab proj
    return jnp.transpose(y, (1, 0, 2))               # (L, B, V) to match PyTorch output
    # TODO(synk): mask_index >= 0 (key-padding mask) path of gen_masks is not
    # implemented; default mask_index=-1 (causal-only) semantics are reproduced.


if __name__ == "__main__":
    # Small, module-consistent shapes
    num_words = 64       # num_words_outputs
    word_dims = 32       # word_dims
    seq_len = 8          # sequence_length_outputs
    batch = 2
    num_decoders = 2     # reduced from default 6 for a small test

    key = jax.random.PRNGKey(0)
    k_tok, k_par = jax.random.split(key)

    tokens = jax.random.randint(k_tok, (seq_len, batch), 0, num_words, dtype=jnp.int32)
    params = init_params(k_par, num_words, word_dims, num_decoders)
    pos_enc = positional_encoding(word_dims, seq_len)

    out = chats_forward(tokens, params, pos_enc)
    out = jax.block_until_ready(out)

    assert out.shape == (seq_len, batch, num_words), out.shape
    assert out.dtype == jnp.float32
    assert bool(jnp.all(jnp.isfinite(out)))
    print("KERNEL_OK")
</pallas_src>

<mosaic_0001>
module attributes {stable_mosaic.version = 11 : i64} {
  func.func @_chats_stack_kernel(%arg0: i32, %arg1: i32, %arg2: memref<2x8x32xf32, #tpu.memory_space<vmem>>, %arg3: memref<1x32x96xf32, #tpu.memory_space<vmem>>, %arg4: memref<1x1x96xf32, #tpu.memory_space<vmem>>, %arg5: memref<1x32x32xf32, #tpu.memory_space<vmem>>, %arg6: memref<1x1x32xf32, #tpu.memory_space<vmem>>, %arg7: memref<1x1x32xf32, #tpu.memory_space<vmem>>, %arg8: memref<1x1x32xf32, #tpu.memory_space<vmem>>, %arg9: memref<1x32x32xf32, #tpu.memory_space<vmem>>, %arg10: memref<1x1x32xf32, #tpu.memory_space<vmem>>, %arg11: memref<1x1x32xf32, #tpu.memory_space<vmem>>, %arg12: memref<1x1x32xf32, #tpu.memory_space<vmem>>, %arg13: memref<32x64xf32, #tpu.memory_space<vmem>>, %arg14: memref<1x64xf32, #tpu.memory_space<vmem>>, %arg15: memref<2x8x64xf32, #tpu.memory_space<vmem>>, %arg16: memref<2x8x32xf32, #tpu.memory_space<vmem>>) attributes {dimension_semantics = [#tpu.dimension_semantics<parallel>, #tpu.dimension_semantics<arbitrary>], iteration_bounds = array<i64: 1, 2>, scalar_prefetch = 0 : i64, scratch_operands = 1 : i64, tpu.core_type = #tpu.core_type<tc>, window_params = [{transform_indices = @transform_0, window_bounds = array<i64: 2, 8, 32>}, {transform_indices = @transform_1, window_bounds = array<i64: 1, 32, 96>}, {transform_indices = @transform_2, window_bounds = array<i64: 1, 1, 96>}, {transform_indices = @transform_3, window_bounds = array<i64: 1, 32, 32>}, {transform_indices = @transform_4, window_bounds = array<i64: 1, 1, 32>}, {transform_indices = @transform_5, window_bounds = array<i64: 1, 1, 32>}, {transform_indices = @transform_6, window_bounds = array<i64: 1, 1, 32>}, {transform_indices = @transform_7, window_bounds = array<i64: 1, 32, 32>}, {transform_indices = @transform_8, window_bounds = array<i64: 1, 1, 32>}, {transform_indices = @transform_9, window_bounds = array<i64: 1, 1, 32>}, {transform_indices = @transform_10, window_bounds = array<i64: 1, 1, 32>}, {pipeline_mode = #tpu.pipeline_mode<synchronous>, transform_indices = @transform_11, window_bounds = array<i64: 32, 64>}, {pipeline_mode = #tpu.pipeline_mode<synchronous>, transform_indices = @transform_12, window_bounds = array<i64: 1, 64>}, {transform_indices = @transform_13, window_bounds = array<i64: 2, 8, 64>}]} {
    %c0_i32 = arith.constant 0 : i32
    %0 = arith.cmpi eq, %arg1, %c0_i32 : i32
    %1 = arith.extui %0 : i1 to i32
    %c0_i32_0 = arith.constant 0 : i32
    %2 = arith.cmpi ne, %1, %c0_i32_0 : i32
    scf.if %2 {
      %c0_55 = arith.constant 0 : index
      %c0_56 = arith.constant 0 : index
      %c0_57 = arith.constant 0 : index
      %111 = vector.load %arg2[%c0_55, %c0_56, %c0_57] : memref<2x8x32xf32, #tpu.memory_space<vmem>>, vector<2x8x32xf32>
      %c0_58 = arith.constant 0 : index
      %c0_59 = arith.constant 0 : index
      %c0_60 = arith.constant 0 : index
      %112 = vector.load %arg16[%c0_58, %c0_59, %c0_60] : memref<2x8x32xf32, #tpu.memory_space<vmem>>, vector<2x8x32xf32>
      tpu.vector_store %arg16[%c0_58, %c0_59, %c0_60], %111 {strides = array<i32>} : memref<2x8x32xf32, #tpu.memory_space<vmem>>, vector<2x8x32xf32>,
    } else {
    }
    %c0 = arith.constant 0 : index
    %c0_1 = arith.constant 0 : index
    %c0_2 = arith.constant 0 : index
    %3 = vector.load %arg16[%c0, %c0_1, %c0_2] : memref<2x8x32xf32, #tpu.memory_space<vmem>>, vector<2x8x32xf32>
    %4 = vector.shape_cast %3 : vector<2x8x32xf32> to vector<16x32xf32>
    %c0_3 = arith.constant 0 : index
    %c0_4 = arith.constant 0 : index
    %c0_5 = arith.constant 0 : index
    %5 = vector.load %arg3[%c0_3, %c0_4, %c0_5] : memref<1x32x96xf32, #tpu.memory_space<vmem>>, vector<1x32x96xf32>
    %6 = vector.shape_cast %5 : vector<1x32x96xf32> to vector<32x96xf32>
    %cst = arith.constant dense<0.000000e+00> : vector<16x96xf32>
    %7 = tpu.matmul %4, %6, %cst {dimension_numbers = #tpu.dot_dimension_numbers<[1], [0], [0], [1], [0, 0, 1, 1], [], []>} : vector<16x32xf32>, vector<32x96xf32>, vector<16x96xf32> -> vector<16x96xf32>
    %c0_6 = arith.constant 0 : index
    %c0_7 = arith.constant 0 : index
    %c0_8 = arith.constant 0 : index
    %8 = vector.load %arg4[%c0_6, %c0_7, %c0_8] : memref<1x1x96xf32, #tpu.memory_space<vmem>>, vector<1x1x96xf32>
    %9 = vector.shape_cast %8 : vector<1x1x96xf32> to vector<1x96xf32>
    %10 = vector.broadcast %9 : vector<1x96xf32> to vector<16x96xf32>
    %11 = arith.addf %7, %10 : vector<16x96xf32>
    %12 = vector.extract_strided_slice %11 {offsets = [0, 0], sizes = [16, 32], strides = [1, 1]} : vector<16x96xf32> to vector<16x32xf32>
    %13 = vector.shape_cast %12 : vector<16x32xf32> to vector<2x8x32xf32>
    %14 = vector.extract_strided_slice %11 {offsets = [0, 32], sizes = [16, 32], strides = [1, 1]} : vector<16x96xf32> to vector<16x32xf32>
    %15 = vector.shape_cast %14 : vector<16x32xf32> to vector<2x8x32xf32>
    %16 = vector.extract_strided_slice %11 {offsets = [0, 64], sizes = [16, 32], strides = [1, 1]} : vector<16x96xf32> to vector<16x32xf32>
    %17 = vector.shape_cast %16 : vector<16x32xf32> to vector<2x8x32xf32>
    %cst_9 = arith.constant dense<0.000000e+00> : vector<2x8x8xf32>
    %18 = tpu.matmul %13, %15, %cst_9 {dimension_numbers = #tpu.dot_dimension_numbers<[2], [2], [1], [1], [0, 0, 0, 1, 1, 1], [0], [0]>} : vector<2x8x32xf32>, vector<2x8x32xf32>, vector<2x8x8xf32> -> vector<2x8x8xf32>
    %cst_10 = arith.constant 0.176776692 : f32
    %19 = vector.broadcast %cst_10 : f32 to vector<2x8x8xf32>
    %20 = arith.mulf %18, %19 : vector<2x8x8xf32>
    %21 = tpu.iota {dimensions = array<i32: 1>} : vector<2x8x8xi32>
    %22 = tpu.iota {dimensions = array<i32: 2>} : vector<2x8x8xi32>
    %23 = arith.cmpi sgt, %22, %21 : vector<2x8x8xi32>
    %cst_11 = arith.constant -1.000000e+30 : f32
    %24 = vector.broadcast %cst_11 : f32 to vector<2x8x8xf32>
    %25 = arith.select %23, %24, %20 : vector<2x8x8xi1>, vector<2x8x8xf32>
    %cst_12 = arith.constant dense<0xFF800000> : vector<2x8xf32>
    %26 = vector.multi_reduction <maximumf>, %25, %cst_12 [2] : vector<2x8x8xf32> to vector<2x8xf32>
    %27 = vector.shape_cast %26 : vector<2x8xf32> to vector<2x8x1xf32>
    %28 = vector.broadcast %27 : vector<2x8x1xf32> to vector<2x8x8xf32>
    %29 = arith.subf %25, %28 : vector<2x8x8xf32>
    %30 = math.exp %29 : vector<2x8x8xf32>
    %cst_13 = arith.constant dense<0.000000e+00> : vector<2x8xf32>
    %31 = vector.multi_reduction <add>, %30, %cst_13 [2] : vector<2x8x8xf32> to vector<2x8xf32>
    %32 = vector.shape_cast %31 : vector<2x8xf32> to vector<2x8x1xf32>
    %33 = tpu.reciprocal %32 {approx = true} : vector<2x8x1xf32> -> vector<2x8x1xf32>
    %34 = vector.broadcast %33 : vector<2x8x1xf32> to vector<2x8x8xf32>
    %35 = arith.mulf %30, %34 : vector<2x8x8xf32>
    %cst_14 = arith.constant dense<0.000000e+00> : vector<2x8x32xf32>
    %36 = tpu.matmul %35, %17, %cst_14 {dimension_numbers = #tpu.dot_dimension_numbers<[2], [1], [1], [2], [0, 0, 0, 1, 1, 2], [0], [0]>} : vector<2x8x8xf32>, vector<2x8x32xf32>, vector<2x8x32xf32> -> vector<2x8x32xf32>
    %37 = vector.shape_cast %36 : vector<2x8x32xf32> to vector<16x32xf32>
    %c0_15 = arith.constant 0 : index
    %c0_16 = arith.constant 0 : index
    %c0_17 = arith.constant 0 : index
    %38 = vector.load %arg5[%c0_15, %c0_16, %c0_17] : memref<1x32x32xf32, #tpu.memory_space<vmem>>, vector<1x32x32xf32>
    %39 = vector.shape_cast %38 : vector<1x32x32xf32> to vector<32x32xf32>
    %cst_18 = arith.constant dense<0.000000e+00> : vector<16x32xf32>
    %40 = tpu.matmul %37, %39, %cst_18 {dimension_numbers = #tpu.dot_dimension_numbers<[1], [0], [0], [1], [0, 0, 1, 1], [], []>} : vector<16x32xf32>, vector<32x32xf32>, vector<16x32xf32> -> vector<16x32xf32>
    %c0_19 = arith.constant 0 : index
    %c0_20 = arith.constant 0 : index
    %c0_21 = arith.constant 0 : index
    %41 = vector.load %arg6[%c0_19, %c0_20, %c0_21] : memref<1x1x32xf32, #tpu.memory_space<vmem>>, vector<1x1x32xf32>
    %42 = vector.shape_cast %41 : vector<1x1x32xf32> to vector<1x32xf32>
    %43 = vector.broadcast %42 : vector<1x32xf32> to vector<16x32xf32>
    %44 = arith.addf %40, %43 : vector<16x32xf32>
    %45 = arith.addf %4, %44 : vector<16x32xf32>
    %cst_22 = arith.constant dense<0.000000e+00> : vector<16xf32>
    %46 = vector.multi_reduction <add>, %45, %cst_22 [1] : vector<16x32xf32> to vector<16xf32>
    %47 = vector.shape_cast %46 : vector<16xf32> to vector<16x1xf32>
    %cst_23 = arith.constant 3.200000e+01 : f32
    %48 = vector.broadcast %cst_23 : f32 to vector<16x1xf32>
    %49 = arith.divf %47, %48 : vector<16x1xf32>
    %50 = arith.mulf %45, %45 : vector<16x32xf32>
    %cst_24 = arith.constant dense<0.000000e+00> : vector<16xf32>
    %51 = vector.multi_reduction <add>, %50, %cst_24 [1] : vector<16x32xf32> to vector<16xf32>
    %52 = vector.shape_cast %51 : vector<16xf32> to vector<16x1xf32>
    %cst_25 = arith.constant 3.200000e+01 : f32
    %53 = vector.broadcast %cst_25 : f32 to vector<16x1xf32>
    %54 = arith.divf %52, %53 : vector<16x1xf32>
    %55 = arith.mulf %49, %49 : vector<16x1xf32>
    %56 = arith.subf %54, %55 : vector<16x1xf32>
    %57 = vector.broadcast %49 : vector<16x1xf32> to vector<16x32xf32>
    %58 = arith.subf %45, %57 : vector<16x32xf32>
    %cst_26 = arith.constant 9.99999974E-6 : f32
    %59 = vector.broadcast %cst_26 : f32 to vector<16x1xf32>
    %60 = arith.addf %56, %59 : vector<16x1xf32>
    %61 = math.rsqrt %60 : vector<16x1xf32>
    %62 = vector.broadcast %61 : vector<16x1xf32> to vector<16x32xf32>
    %63 = arith.mulf %58, %62 : vector<16x32xf32>
    %c0_27 = arith.constant 0 : index
    %c0_28 = arith.constant 0 : index
    %c0_29 = arith.constant 0 : index
    %64 = vector.load %arg7[%c0_27, %c0_28, %c0_29] : memref<1x1x32xf32, #tpu.memory_space<vmem>>, vector<1x1x32xf32>
    %65 = vector.shape_cast %64 : vector<1x1x32xf32> to vector<1x32xf32>
    %66 = vector.broadcast %65 : vector<1x32xf32> to vector<16x32xf32>
    %67 = arith.mulf %63, %66 : vector<16x32xf32>
    %c0_30 = arith.constant 0 : index
    %c0_31 = arith.constant 0 : index
    %c0_32 = arith.constant 0 : index
    %68 = vector.load %arg8[%c0_30, %c0_31, %c0_32] : memref<1x1x32xf32, #tpu.memory_space<vmem>>, vector<1x1x32xf32>
    %69 = vector.shape_cast %68 : vector<1x1x32xf32> to vector<1x32xf32>
    %70 = vector.broadcast %69 : vector<1x32xf32> to vector<16x32xf32>
    %71 = arith.addf %67, %70 : vector<16x32xf32>
    %c0_33 = arith.constant 0 : index
    %c0_34 = arith.constant 0 : index
    %c0_35 = arith.constant 0 : index
    %72 = vector.load %arg9[%c0_33, %c0_34, %c0_35] : memref<1x32x32xf32, #tpu.memory_space<vmem>>, vector<1x32x32xf32>
    %73 = vector.shape_cast %72 : vector<1x32x32xf32> to vector<32x32xf32>
    %cst_36 = arith.constant dense<0.000000e+00> : vector<16x32xf32>
    %74 = tpu.matmul %71, %73, %cst_36 {dimension_numbers = #tpu.dot_dimension_numbers<[1], [0], [0], [1], [0, 0, 1, 1], [], []>} : vector<16x32xf32>, vector<32x32xf32>, vector<16x32xf32> -> vector<16x32xf32>
    %c0_37 = arith.constant 0 : index
    %c0_38 = arith.constant 0 : index
    %c0_39 = arith.constant 0 : index
    %75 = vector.load %arg10[%c0_37, %c0_38, %c0_39] : memref<1x1x32xf32, #tpu.memory_space<vmem>>, vector<1x1x32xf32>
    %76 = vector.shape_cast %75 : vector<1x1x32xf32> to vector<1x32xf32>
    %77 = vector.broadcast %76 : vector<1x32xf32> to vector<16x32xf32>
    %78 = arith.addf %74, %77 : vector<16x32xf32>
    %79 = arith.addf %71, %78 : vector<16x32xf32>
    %cst_40 = arith.constant dense<0.000000e+00> : vector<16xf32>
    %80 = vector.multi_reduction <add>, %79, %cst_40 [1] : vector<16x32xf32> to vector<16xf32>
    %81 = vector.shape_cast %80 : vector<16xf32> to vector<16x1xf32>
    %cst_41 = arith.constant 3.200000e+01 : f32
    %82 = vector.broadcast %cst_41 : f32 to vector<16x1xf32>
    %83 = arith.divf %81, %82 : vector<16x1xf32>
    %84 = arith.mulf %79, %79 : vector<16x32xf32>
    %cst_42 = arith.constant dense<0.000000e+00> : vector<16xf32>
    %85 = vector.multi_reduction <add>, %84, %cst_42 [1] : vector<16x32xf32> to vector<16xf32>
    %86 = vector.shape_cast %85 : vector<16xf32> to vector<16x1xf32>
    %cst_43 = arith.constant 3.200000e+01 : f32
    %87 = vector.broadcast %cst_43 : f32 to vector<16x1xf32>
    %88 = arith.divf %86, %87 : vector<16x1xf32>
    %89 = arith.mulf %83, %83 : vector<16x1xf32>
    %90 = arith.subf %88, %89 : vector<16x1xf32>
    %91 = vector.broadcast %83 : vector<16x1xf32> to vector<16x32xf32>
    %92 = arith.subf %79, %91 : vector<16x32xf32>
    %cst_44 = arith.constant 9.99999974E-6 : f32
    %93 = vector.broadcast %cst_44 : f32 to vector<16x1xf32>
    %94 = arith.addf %90, %93 : vector<16x1xf32>
    %95 = math.rsqrt %94 : vector<16x1xf32>
    %96 = vector.broadcast %95 : vector<16x1xf32> to vector<16x32xf32>
    %97 = arith.mulf %92, %96 : vector<16x32xf32>
    %c0_45 = arith.constant 0 : index
    %c0_46 = arith.constant 0 : index
    %c0_47 = arith.constant 0 : index
    %98 = vector.load %arg11[%c0_45, %c0_46, %c0_47] : memref<1x1x32xf32, #tpu.memory_space<vmem>>, vector<1x1x32xf32>
    %99 = vector.shape_cast %98 : vector<1x1x32xf32> to vector<1x32xf32>
    %100 = vector.broadcast %99 : vector<1x32xf32> to vector<16x32xf32>
    %101 = arith.mulf %97, %100 : vector<16x32xf32>
    %c0_48 = arith.constant 0 : index
    %c0_49 = arith.constant 0 : index
    %c0_50 = arith.constant 0 : index
    %102 = vector.load %arg12[%c0_48, %c0_49, %c0_50] : memref<1x1x32xf32, #tpu.memory_space<vmem>>, vector<1x1x32xf32>
    %103 = vector.shape_cast %102 : vector<1x1x32xf32> to vector<1x32xf32>
    %104 = vector.broadcast %103 : vector<1x32xf32> to vector<16x32xf32>
    %105 = arith.addf %101, %104 : vector<16x32xf32>
    %106 = vector.shape_cast %105 : vector<16x32xf32> to vector<2x8x32xf32>
    %c0_51 = arith.constant 0 : index
    %c0_52 = arith.constant 0 : index
    %c0_53 = arith.constant 0 : index
    %107 = vector.load %arg16[%c0_51, %c0_52, %c0_53] : memref<2x8x32xf32, #tpu.memory_space<vmem>>, vector<2x8x32xf32>
    tpu.vector_store %arg16[%c0_51, %c0_52, %c0_53], %106 {strides = array<i32>} : memref<2x8x32xf32, #tpu.memory_space<vmem>>, vector<2x8x32xf32>,
    %c1_i32 = arith.constant 1 : i32
    %108 = arith.cmpi eq, %arg1, %c1_i32 : i32
    %109 = arith.extui %108 : i1 to i32
    %c0_i32_54 = arith.constant 0 : i32
    %110 = arith.cmpi ne, %109, %c0_i32_54 : i32
    scf.if %110 {
      %c0_55 = arith.constant 0 : index
      %c0_56 = arith.constant 0 : index
      %111 = vector.load %arg13[%c0_55, %c0_56] : memref<32x64xf32, #tpu.memory_space<vmem>>, vector<32x64xf32>
      %cst_57 = arith.constant dense<0.000000e+00> : vector<16x64xf32>
      %112 = tpu.matmul %105, %111, %cst_57 {dimension_numbers = #tpu.dot_dimension_numbers<[1], [0], [0], [1], [0, 0, 1, 1], [], []>} : vector<16x32xf32>, vector<32x64xf32>, vector<16x64xf32> -> vector<16x64xf32>
      %c0_58 = arith.constant 0 : index
      %c0_59 = arith.constant 0 : index
      %113 = vector.load %arg14[%c0_58, %c0_59] : memref<1x64xf32, #tpu.memory_space<vmem>>, vector<1x64xf32>
      %114 = vector.broadcast %113 : vector<1x64xf32> to vector<16x64xf32>
      %115 = arith.addf %112, %114 : vector<16x64xf32>
      %116 = vector.shape_cast %115 : vector<16x64xf32> to vector<2x8x64xf32>
      %c0_60 = arith.constant 0 : index
      %c0_61 = arith.constant 0 : index
      %c0_62 = arith.constant 0 : index
      %117 = vector.load %arg15[%c0_60, %c0_61, %c0_62] : memref<2x8x64xf32, #tpu.memory_space<vmem>>, vector<2x8x64xf32>
      tpu.vector_store %arg15[%c0_60, %c0_61, %c0_62], %116 {strides = array<i32>} : memref<2x8x64xf32, #tpu.memory_space<vmem>>, vector<2x8x64xf32>,
    } else {
    }
    return
  }
  func.func @transform_0(%arg0: i32, %arg1: i32) -> (i32, i32, i32) {
    %c0_i32 = arith.constant 0 : i32
    %c0_i32_0 = arith.constant 0 : i32
    %c0_i32_1 = arith.constant 0 : i32
    return %arg0, %c0_i32, %c0_i32_0 : i32, i32, i32
  }
  func.func @transform_1(%arg0: i32, %arg1: i32) -> (i32, i32, i32) {
    %c0_i32 = arith.constant 0 : i32
    %c0_i32_0 = arith.constant 0 : i32
    %c0_i32_1 = arith.constant 0 : i32
    return %arg1, %c0_i32, %c0_i32_0 : i32, i32, i32
  }
  func.func @transform_2(%arg0: i32, %arg1: i32) -> (i32, i32, i32) {
    %c0_i32 = arith.constant 0 : i32
    %c0_i32_0 = arith.constant 0 : i32
    %c0_i32_1 = arith.constant 0 : i32
    return %arg1, %c0_i32, %c0_i32_0 : i32, i32, i32
  }
  func.func @transform_3(%arg0: i32, %arg1: i32) -> (i32, i32, i32) {
    %c0_i32 = arith.constant 0 : i32
    %c0_i32_0 = arith.constant 0 : i32
    %c0_i32_1 = arith.constant 0 : i32
    return %arg1, %c0_i32, %c0_i32_0 : i32, i32, i32
  }
  func.func @transform_4(%arg0: i32, %arg1: i32) -> (i32, i32, i32) {
    %c0_i32 = arith.constant 0 : i32
    %c0_i32_0 = arith.constant 0 : i32
    %c0_i32_1 = arith.constant 0 : i32
    return %arg1, %c0_i32, %c0_i32_0 : i32, i32, i32
  }
  func.func @transform_5(%arg0: i32, %arg1: i32) -> (i32, i32, i32) {
    %c0_i32 = arith.constant 0 : i32
    %c0_i32_0 = arith.constant 0 : i32
    %c0_i32_1 = arith.constant 0 : i32
    return %arg1, %c0_i32, %c0_i32_0 : i32, i32, i32
  }
  func.func @transform_6(%arg0: i32, %arg1: i32) -> (i32, i32, i32) {
    %c0_i32 = arith.constant 0 : i32
    %c0_i32_0 = arith.constant 0 : i32
    %c0_i32_1 = arith.constant 0 : i32
    return %arg1, %c0_i32, %c0_i32_0 : i32, i32, i32
  }
  func.func @transform_7(%arg0: i32, %arg1: i32) -> (i32, i32, i32) {
    %c0_i32 = arith.constant 0 : i32
    %c0_i32_0 = arith.constant 0 : i32
    %c0_i32_1 = arith.constant 0 : i32
    return %arg1, %c0_i32, %c0_i32_0 : i32, i32, i32
  }
  func.func @transform_8(%arg0: i32, %arg1: i32) -> (i32, i32, i32) {
    %c0_i32 = arith.constant 0 : i32
    %c0_i32_0 = arith.constant 0 : i32
    %c0_i32_1 = arith.constant 0 : i32
    return %arg1, %c0_i32, %c0_i32_0 : i32, i32, i32
  }
  func.func @transform_9(%arg0: i32, %arg1: i32) -> (i32, i32, i32) {
    %c0_i32 = arith.constant 0 : i32
    %c0_i32_0 = arith.constant 0 : i32
    %c0_i32_1 = arith.constant 0 : i32
    return %arg1, %c0_i32, %c0_i32_0 : i32, i32, i32
  }
  func.func @transform_10(%arg0: i32, %arg1: i32) -> (i32, i32, i32) {
    %c0_i32 = arith.constant 0 : i32
    %c0_i32_0 = arith.constant 0 : i32
    %c0_i32_1 = arith.constant 0 : i32
    return %arg1, %c0_i32, %c0_i32_0 : i32, i32, i32
  }
  func.func @transform_11(%arg0: i32, %arg1: i32) -> (i32, i32) {
    %c0_i32 = arith.constant 0 : i32
    %c0_i32_0 = arith.constant 0 : i32
    %c0_i32_1 = arith.constant 0 : i32
    return %c0_i32, %c0_i32_0 : i32, i32
  }
  func.func @transform_12(%arg0: i32, %arg1: i32) -> (i32, i32) {
    %c0_i32 = arith.constant 0 : i32
    %c0_i32_0 = arith.constant 0 : i32
    %c0_i32_1 = arith.constant 0 : i32
    return %c0_i32, %c0_i32_0 : i32, i32
  }
  func.func @transform_13(%arg0: i32, %arg1: i32) -> (i32, i32, i32) {
    %c0_i32 = arith.constant 0 : i32
    %c0_i32_0 = arith.constant 0 : i32
    %c0_i32_1 = arith.constant 0 : i32
    return %arg0, %c0_i32, %c0_i32_0 : i32, i32, i32
  }
}

</mosaic_0001>

<bundles_post_ra>
// kernel: chats_forward.1
= control target key start
LH: loop header
LB: loop body
LE: loop exit
PB: predicated region body
PF: predicated region fallthrough
CT: control target
= control target key end

     0   :  { %s1886_s25 = smov 0   ;;  %s1888_s26 = smov 0   ;;  %s2073_s0 = inlined_call_operand.vmem [shape: f32[2,8,32], index: 0, kind: input, shape index: {}]   ;;  %s2074_s1 = inlined_call_operand.vmem [shape: f32[2,32,96], index: 1, kind: input, shape index: {}]   ;;  %s2075_s2 = inlined_call_operand.vmem [shape: f32[2,1,96], index: 2, kind: input, shape index: {}]   ;;  %s2076_s3 = inlined_call_operand.vmem [shape: f32[2,32,32], index: 3, kind: input, shape index: {}]   ;;  %s2077_s4 = inlined_call_operand.vmem [shape: f32[2,1,32], index: 4, kind: input, shape index: {}]   ;;  %s2078_s5 = inlined_call_operand.vmem [shape: f32[2,1,32], index: 5, kind: input, shape index: {}]   ;;  %s2079_s6 = inlined_call_operand.vmem [shape: f32[2,1,32], index: 6, kind: input, shape index: {}]   ;;  %s2080_s7 = inlined_call_operand.vmem [shape: f32[2,32,32], index: 7, kind: input, shape index: {}]   ;;  %s2081_s8 = inlined_call_operand.vmem [shape: f32[2,1,32], index: 8, kind: input, shape index: {}]   ;;  %s2082_s9 = inlined_call_operand.vmem [shape: f32[2,1,32], index: 9, kind: input, shape index: {}]   ;;  %s2083_s10 = inlined_call_operand.vmem [shape: f32[2,1,32], index: 10, kind: input, shape index: {}]   ;;  %s2084_s11 = inlined_call_operand.vmem [shape: f32[32,64], index: 11, kind: input, shape index: {}]   ;;  %s2085_s12 = inlined_call_operand.vmem [shape: f32[1,64], index: 12, kind: input, shape index: {}]   ;;  %s2086_s13 = inlined_call_operand.vmem [shape: f32[2,8,64], index: 13, kind: output, shape index: {}]  }
   0x1   :  { %2090 = sst [smem:[#allocation6_spill]] %s2074_s1  ;;  %s1890_s27 = smov 0  }
   0x2   :  { %2091 = sst [smem:[#allocation7_spill]] %s2076_s3 }
   0x3   :  { %2092 = sst [smem:[#allocation8_spill]] %s2085_s12 }
   0x4   :  { %2093 = sst [smem:[#allocation9_spill]] %s2086_s13 }
   0x5 LB: > { %2094 = sst [smem:[#allocation3_spill]] %s1806_s26  ;;  %s32_s28 = sadd.s32 1, %s1806_s26  ;;  %s1810_s27 = sphi %s1890_s27, %s23_s27   ;;  %s1806_s26 = sphi %s1888_s26, %s2105_s26   ;;  %s1802_s25 = sphi %s1886_s25, %s2104_s25  }
   0x6   : > { %2095 = sst [smem:[#allocation4_spill]] %s1810_s27  ;;  %p1610_p0 = scmp.ge.s32.totalorder %s1810_s27, 1 }
   0x7   : > { %p33_p1 = scmp.ge.s32.totalorder %s32_s28, 2  ;;  %p486_p2 = scmp.lt.s32.totalorder %s1810_s27, 3 }
   0x9   : > { %s2107_s28 = smov (%p33_p1, %s32_s28), 0  ;;  %p487_p3 = pnand %p1610_p0, %p486_p2 }
   0xa   : > { %2096 = sst [smem:[#allocation5_spill]] %s2107_s28  ;;  %p572_p4 = scmp.lt.s32.totalorder (!%p487_p3), %s1802_s25, 1 }
   0xb   : > { %490 = sbr.rel (%p487_p3) target bundleno = 2010 (0x7da), region = 72  ;;  %s2097_s1 = sld [smem:[#allocation6_spill]] (!%p487_p3) }
   0xc   : > { %s2098_s3 = sld [smem:[#allocation7_spill]] (!%p487_p3)  ;;  %p1617_p5 = scmp.ne.s32.totalorder (!%p487_p3), %s1802_s25, 0 }
  0x10   : > { %s1908_s29 = scalar_select %p572_p4, %s1802_s25, 1 }
  0x12   : > { %s1645_s30 = sshll.u32 %s1908_s29, 5  ;;  %s590_s13 = scalar_lea.vmem %s2078_s5, %s1908_s29 }
  0x13   : > { %s576_s19 = scalar_lea.vmem %s2097_s1, %s1645_s30  ;;  %s1921_s22 = scalar_lea.vmem %s2098_s3, %s1645_s30 }
  0x14   : > { %s593_s15 = scalar_lea.vmem %s2079_s6, %s1908_s29  ;;  %s1938_s18 = scalar_lea.vmem %s2080_s7, %s1645_s30 }
  0x15   : > { %s601_s1 = scalar_lea.vmem %s2081_s8, %s1908_s29  ;;  %s604_s24 = scalar_lea.vmem %s2082_s9, %s1908_s29 }
  0x16   : > { %s607_s27 = scalar_lea.vmem %s2083_s10, %s1908_s29  ;;  %617 = sbr.rel (%p1617_p5) target bundleno = 29 (0x1d), region = 76 }
  0x1b   : > { %v618_v0 = vld [vmem:[%s2073_s0] sm:$0xff]  ;;  %vm620_vm0 = vcmask 261120   ;;  %v619_v1 = vld [vmem:[%s2073_s0 + $0x8] sm:$0xff] }
  0x1c   : > { %621 = vst.msk [vmem:[#allocation2] sm:$0xff] %vm620_vm0, %v618_v0  ;;  %622 = vst.msk [vmem:[#allocation2 + $0x8] sm:$0xff] %vm620_vm0, %v619_v1 }
  0x1d PF: > { %v628_v2 = vld [vmem:[%s576_s19 + $0x18] sm:$0xff]  ;;  %v627_v3 = vld [vmem:[%s576_s19 + $0x10] sm:$0xff]  ;;  %vm636_vm1 = vcmask 261120   ;;  %v626_v5 = vld [vmem:[%s576_s19 + $0x8] sm:$0xff]  ;;  %v1812_v8 = vmov 0.0   ;;  %vm1813_vm2 = vmmov 0   ;;  %v874_v16 = vlaneseq  ;;  %s2100_s26 = scalar_lea.vmem %s2077_s4, %s1908_s29 }
  0x1e   : > { %1680 = vmatprep.subr.mxu0 %v628_v2  ;;  %v625_v6 = vld [vmem:[%s576_s19] sm:$0xff]  ;;  %1691 = vmatprep.subr.mxu1 %v1812_v8  ;;  %s2099_s19 = scalar_lea.vmem %s2075_s2, %s1908_s29  ;;  %s1814_s17 = smov 96   ;;  %vm881_vm4 = vcmask 64512   ;;  %v1059_v40 = vld [vmem:[%s1921_s22 + $0x18] sm:$0xff]  ;;  %v1058_v46 = vld [vmem:[%s1921_s22 + $0x10] sm:$0xff] }
  0x1f   : > { %1681 = vmatpush3.msra.mxu0 %v628_v2  ;;  %1693 = vmatprep.mubr.msk.f32.mxu1 %vm1813_vm2, %v1812_v8  ;;  %v1618_v10 = vld [vmem:[%s2099_s19] ss:$0 sm:$0xff]  ;;  %v875_v17 = vshrl.u32 %v874_v16, 7  ;;  %v877_v18 = vand.u32 127, %v874_v16  ;;  %s1815_s20 = smov 64   ;;  %v1057_v49 = vld [vmem:[%s1921_s22 + $0x8] sm:$0xff] }
  0x20   : > { %1682 = vmatprep.subr.mxu0 %v627_v3  ;;  %v1056_v50 = vld [vmem:[%s1921_s22] sm:$0xff]  ;;  %p1637_p6 = scmp.ne.s32.totalorder %s1802_s25, 1 }
  0x21   : > { %1683 = vmatpush3.msra.mxu0 %v627_v3  ;;  %vm878_vm3 = vcmp.gt.s32.totalorder %v877_v18, %v875_v17  ;;  %v1627_v55 = vld [vmem:[%s2100_s26] ss:$0 sm:$0xff]  ;;  %s2101_s26 = sld [smem:[#allocation8_spill]] (!%p1637_p6) }
  0x22   : > { %1684 = vmatprep.subr.mxu0 %v626_v5  ;;  %s2102_s12 = sld [smem:[#allocation9_spill]] (!%p1637_p6) }
  0x23   : > { %v1959_v4 = vld [vmem:[#allocation2] sm:$0xff]  ;;  %1685 = vmatpush3.msra.mxu0 %v626_v5  ;;  %v1963_v7 = vld [vmem:[#allocation2 + $0x8] sm:$0xff]  ;;  %v1202_v5 = vld [vmem:[%s1938_s18 + $0x18] sm:$0xff] }
  0x24   : > { %1688 = vmatprep.mubr.msk.f32.mxu0 %vm636_vm1, %v1959_v4  ;;  %1686 = vmatprep.subr.mxu0 %v625_v6 }
  0x25   : > { %1687 = vmatpush3.msra.mxu0 %v625_v6  ;;  %v1201_v6 = vld [vmem:[%s1938_s18 + $0x10] sm:$0xff] }
  0x26   : > { %1689 = vmatmul.mubr.msk.f32.vlgmr.msra.gmra.mxu0 %vm636_vm1, %v1963_v7  ;;  %1701 = vmatprep.subr.mxu0 %v1812_v8 }
  0x27   : > { %1703 = vmatprep.mubr.msk.f32.mxu0 %vm1813_vm2, %v1812_v8 }
  0xe6   : > { %v1690_v9 = vpop.f32.mrf.mxu0 }
  0xe7   : > { %v715_v13 = vadd.f32 %v1690_v9, %v1618_v10 }
  0xe8   : > { %v709_v11 = vpop.f32.mrf.mxu0 }
  0xe9   : > { %v710_v12 = vadd.f32 %v1618_v10, %v709_v11 }
  0xeb   : > { %719 = vrot.lane.b32.xlu0 %v710_v12, %s1814_s17 }
  0xef   : > { %796 = vrot.lane.b32.xlu0 %v715_v13, %s1814_s17 }
 0x15d   : > { %v720_v14 = vpop.permute.xlu0 %719 }
 0x15e   : > { %1692 = vmatpush3.xpose.msk.msra.mxu1 %vm636_vm1, %v720_v14 }
 0x15f   : > { %1696 = vmatprep.subr.mxu1 %v1812_v8 }
 0x161   : > { %1694 = vmatmul.mubr.msk.f32.vlgmr.msra.gmra.mxu1 %vm636_vm1, %v710_v12  ;;  %v797_v15 = vpop.permute.xlu0 %796 }
 0x162   : > { %1697 = vmatpush3.xpose.msk.msra.mxu1 %vm636_vm1, %v797_v15  ;;  %1698 = vmatprep.mubr.msk.f32.mxu1 %vm1813_vm2, %v1812_v8 }
 0x163   : > { %1706 = vmatprep.subr.mxu1 %v1812_v8 }
 0x165   : > { %1699 = vmatmul.mubr.msk.f32.vlgmr.msra.gmra.mxu1 %vm636_vm1, %v715_v13 }
 0x166   : > { %1708 = vmatprep.mubr.msk.f32.mxu1 %vm1813_vm2, %v1812_v8 }
 0x221   : > { %v791_v19 = vpop.f32.mrf.mxu1 }
 0x222   : > { %v872_v20 = vmul.f32 0.17677669, %v791_v19 }
 0x223   : > { %v1695_v21 = vpop.f32.mrf.mxu1 }
 0x224   : > { %v879_v22 = vsel %vm878_vm3, -1e+30, %v872_v20 }
 0x225   : > { %v868_v23 = vpop.f32.mrf.mxu1  ;;  %v882_v24 = vsel %vm881_vm4, %v879_v22, -inf }
 0x226   : > { %v873_v25 = vmul.f32 0.17677669, %v868_v23  ;;  %883 = vmax.xlane.f32.xlu1 %v882_v24  ;;  %v1630_v24 = vld [vmem:[%s590_s13] ss:$0 sm:$0xff] }
 0x227   : > { %v1700_v26 = vpop.f32.mrf.mxu1 }
 0x228   : > { %v880_v27 = vsel %vm878_vm3, -1e+30, %v873_v25  ;;  %v1631_v26 = vld [vmem:[%s593_s15] ss:$0 sm:$0xff] }
 0x229   : > { %v885_v28 = vsel %vm881_vm4, %v880_v27, -inf }
 0x22a   : > { %886 = vmax.xlane.f32.xlu1 %v885_v28 }
 0x23b   : > { %904 = vrot.lane.b32.xlu1 %v710_v12, %s1815_s20 }
 0x2af   : > { %v884_v29 = vpop.xlane.xlu1 %883 }
 0x2b0   : > { %v888_v30 = vsub.f32 %v879_v22, %v884_v29 }
 0x2b2   : > { %v890_v31 = vmul.f32 1.442695, %v888_v30 }
 0x2b3   : > { %v887_v32 = vpop.xlane.xlu1 %886 }
 0x2b4   : > { %1772 = vpow2.f32 %v890_v31  ;;  %v889_v33 = vsub.f32 %v880_v27, %v887_v32 }
 0x2b6   : > { %v892_v34 = vmul.f32 1.442695, %v889_v33 }
 0x2b7   : > { %v905_v35 = vpop.permute.xlu1 %904 }
 0x2b8   : > { %1774 = vpow2.f32 %v892_v34  ;;  %1702 = vmatpush3.msra.mxu0 %v905_v35  ;;  %v1632_v34 = vld [vmem:[%s601_s1] ss:$0 sm:$0xff] }
 0x2b9   : > { %1711 = vmatprep.subr.mxu0 %v1059_v40 }
 0x2c1   : > { %v1773_v36 = vpop.eup %1772 }
 0x2c2   : > { %v894_v37 = vsel %vm881_vm4, %v1773_v36, 0.0 }
 0x2c3   : > { %895 = vadd.xlane.f32.xlu0 %v894_v37 }
 0x2c5   : > { %v1775_v38 = vpop.eup %1774 }
 0x2c6   : > { %v897_v39 = vsel %vm881_vm4, %v1775_v38, 0.0 }
 0x2c7   : > { %898 = vadd.xlane.f32.xlu1 %v897_v39 }
 0x2d8   : > { %980 = vrot.lane.b32.xlu1 %v715_v13, %s1815_s20 }
 0x34c   : > { %v896_v41 = vpop.xlane.xlu0 %895 }
 0x34d   : > { %1776 = vrcp.f32 %v896_v41 }
 0x350   : > { %v899_v42 = vpop.xlane.xlu1 %898 }
 0x351   : > { %1778 = vrcp.f32 %v899_v42 }
 0x354   : > { %v981_v43 = vpop.permute.xlu1 %980 }
 0x355   : > { %1707 = vmatpush3.msra.mxu1 %v981_v43 }
 0x356   : > { %1722 = vmatprep.subr.mxu1 %v1202_v5 }
 0x35a   : > { %v1777_v44 = vpop.eup %1776 }
 0x35b   : > { %v902_v45 = vmul.f32 %v1777_v44, %v1773_v36 }
 0x35d   : > { %1704 = vmatmul.mubr.msk.f32.vlgmr.msra.gmra.mxu0 %vm881_vm4, %v902_v45 }
 0x35e   : > { %v1779_v47 = vpop.eup %1778  ;;  %1712 = vmatpush3.msra.mxu0 %v1059_v40 }
 0x35f   : > { %v903_v48 = vmul.f32 %v1779_v47, %v1775_v38  ;;  %1713 = vmatprep.subr.mxu0 %v1058_v46 }
 0x360   : > { %1714 = vmatpush3.msra.mxu0 %v1058_v46 }
 0x361   : > { %1709 = vmatmul.mubr.msk.f32.vlgmr.msra.gmra.mxu1 %vm881_vm4, %v903_v48  ;;  %1715 = vmatprep.subr.mxu0 %v1057_v49 }
 0x362   : > { %1716 = vmatpush3.msra.mxu0 %v1057_v49  ;;  %1723 = vmatpush3.msra.mxu1 %v1202_v5 }
 0x363   : > { %1717 = vmatprep.subr.mxu0 %v1056_v50  ;;  %1724 = vmatprep.subr.mxu1 %v1201_v6 }
 0x364   : > { %1718 = vmatpush3.msra.mxu0 %v1056_v50  ;;  %1725 = vmatpush3.msra.mxu1 %v1201_v6 }
 0x41d   : > { %v976_v51 = vpop.f32.mrf.mxu0 }
 0x41e   : > { %1719 = vmatprep.mubr.msk.f32.mxu0 %vm636_vm1, %v976_v51 }
 0x41f   : > { %v1705_v52 = vpop.f32.mrf.mxu0 }
 0x421   : > { %v1052_v53 = vpop.f32.mrf.mxu1 }
 0x422   : > { %1720 = vmatmul.mubr.msk.f32.vlgmr.msra.gmra.mxu0 %vm636_vm1, %v1052_v53 }
 0x423   : > { %v1710_v54 = vpop.f32.mrf.mxu1 }
 0x4e2   : > { %v1721_v56 = vpop.f32.mrf.mxu0 }
 0x4e3   : > { %v1145_v57 = vadd.f32 %v1721_v56, %v1627_v55 }
 0x4e4   : > { %v1139_v58 = vpop.f32.mrf.mxu0 }
 0x4e5   : > { %v1149_v59 = vadd.f32 %v1145_v57, %v1963_v7  ;;  %v1140_v60 = vadd.f32 %v1627_v55, %v1139_v58  ;;  %v1199_v7 = vld [vmem:[%s1938_s18] sm:$0xff] }
 0x4e7   : > { %v1148_v61 = vadd.f32 %v1140_v60, %v1959_v4  ;;  %v1153_v62 = vsel %vm636_vm1, %v1149_v59, 0.0  ;;  %v1160_v2 = vmul.f32 %v1149_v59, %v1149_v59  ;;  %v1200_v4 = vld [vmem:[%s1938_s18 + $0x8] sm:$0xff] }
 0x4e8   : > { %1154 = vadd.xlane.f32.xlu0 %v1153_v62  ;;  %1726 = vmatprep.subr.mxu1 %v1200_v4 }
 0x4e9   : > { %v1150_v63 = vsel %vm636_vm1, %v1148_v61, 0.0  ;;  %v1159_v0 = vmul.f32 %v1148_v61, %v1148_v61  ;;  %v1164_v3 = vsel %vm636_vm1, %v1160_v2, 0.0  ;;  %1727 = vmatpush3.msra.mxu1 %v1200_v4 }
 0x4ea   : > { %1151 = vadd.xlane.f32.xlu1 %v1150_v63  ;;  %1728 = vmatprep.subr.mxu1 %v1199_v7  ;;  %v1635_v63 = vld [vmem:[%s604_s24] ss:$0 sm:$0xff] }
 0x4eb   : > { %v1161_v1 = vsel %vm636_vm1, %v1159_v0, 0.0  ;;  %1729 = vmatpush3.msra.mxu1 %v1199_v7 }
 0x4ec   : > { %1162 = vadd.xlane.f32.xlu0 %v1161_v1  ;;  %v1636_v1 = vld [vmem:[%s607_s27] ss:$0 sm:$0xff] }
 0x4f0   : > { %1165 = vadd.xlane.f32.xlu0 %v1164_v3 }
 0x571   : > { %v1155_v8 = vpop.xlane.xlu0 %1154 }
 0x572   : > { %v1158_v12 = vmul.f32 0.03125, %v1155_v8 }
 0x573   : > { %v1152_v9 = vpop.xlane.xlu1 %1151 }
 0x574   : > { %v1157_v10 = vmul.f32 0.03125, %v1152_v9  ;;  %v1170_v17 = vmul.f32 %v1158_v12, %v1158_v12  ;;  %v1174_v27 = vsub.f32 %v1149_v59, %v1158_v12 }
 0x575   : > { %v1163_v11 = vpop.xlane.xlu0 %1162 }
 0x576   : > { %v1169_v13 = vmul.f32 %v1157_v10, %v1157_v10  ;;  %v1167_v14 = vmul.f32 0.03125, %v1163_v11  ;;  %v1173_v22 = vsub.f32 %v1148_v61, %v1157_v10 }
 0x578   : > { %v1171_v15 = vsub.f32 %v1167_v14, %v1169_v13 }
 0x579   : > { %v1166_v16 = vpop.xlane.xlu0 %1165 }
 0x57a   : > { %v1175_v18 = vadd.f32 1e-05, %v1171_v15  ;;  %v1168_v19 = vmul.f32 0.03125, %v1166_v16 }
 0x57c   : > { %1780 = vrsqrt.f32 %v1175_v18  ;;  %v1172_v20 = vsub.f32 %v1168_v19, %v1170_v17 }
 0x57e   : > { %v1176_v21 = vadd.f32 1e-05, %v1172_v20 }
 0x580   : > { %1782 = vrsqrt.f32 %v1176_v21 }
 0x589   : > { %v1781_v23 = vpop.eup %1780 }
 0x58a   : > { %v1179_v25 = vmul.f32 %v1781_v23, %v1173_v22 }
 0x58c   : > { %v1188_v28 = vmul.f32 %v1630_v24, %v1179_v25 }
 0x58d   : > { %v1783_v29 = vpop.eup %1782 }
 0x58e   : > { %v1180_v30 = vmul.f32 %v1783_v29, %v1174_v27  ;;  %v1197_v31 = vadd.f32 %v1631_v26, %v1188_v28 }
 0x590   : > { %v1189_v32 = vmul.f32 %v1630_v24, %v1180_v30  ;;  %1730 = vmatprep.mubr.msk.f32.mxu1 %vm636_vm1, %v1197_v31 }
 0x592   : > { %v1198_v33 = vadd.f32 %v1631_v26, %v1189_v32 }
 0x594   : > { %1731 = vmatmul.mubr.msk.f32.vlgmr.msra.gmra.mxu1 %vm636_vm1, %v1198_v33 }
 0x654   : > { %v1732_v35 = vpop.f32.mrf.mxu1 }
 0x655   : > { %v1288_v36 = vadd.f32 %v1732_v35, %v1632_v34 }
 0x656   : > { %v1282_v37 = vpop.f32.mrf.mxu1 }
 0x657   : > { %v1292_v38 = vadd.f32 %v1288_v36, %v1198_v33  ;;  %v1283_v39 = vadd.f32 %v1632_v34, %v1282_v37 }
 0x659   : > { %v1291_v40 = vadd.f32 %v1283_v39, %v1197_v31  ;;  %v1296_v41 = vsel %vm636_vm1, %v1292_v38, 0.0  ;;  %v1302_v45 = vmul.f32 %v1292_v38, %v1292_v38 }
 0x65a   : > { %1297 = vadd.xlane.f32.xlu0 %v1296_v41 }
 0x65b   : > { %v1293_v42 = vsel %vm636_vm1, %v1291_v40, 0.0  ;;  %v1301_v43 = vmul.f32 %v1291_v40, %v1291_v40  ;;  %v1306_v46 = vsel %vm636_vm1, %v1302_v45, 0.0 }
 0x65d   : > { %v1303_v44 = vsel %vm636_vm1, %v1301_v43, 0.0 }
 0x65e   : > { %1294 = vadd.xlane.f32.xlu0 %v1293_v42 }
 0x662   : > { %1304 = vadd.xlane.f32.xlu0 %v1303_v44 }
 0x666   : > { %1307 = vadd.xlane.f32.xlu0 %v1306_v46 }
 0x6e3   : > { %v1298_v47 = vpop.xlane.xlu0 %1297 }
 0x6e4   : > { %v1300_v51 = vmul.f32 0.03125, %v1298_v47 }
 0x6e6   : > { %v1312_v56 = vmul.f32 %v1300_v51, %v1300_v51  ;;  %v1316_v2 = vsub.f32 %v1292_v38, %v1300_v51 }
 0x6e7   : > { %v1295_v48 = vpop.xlane.xlu0 %1294 }
 0x6e8   : > { %v1299_v49 = vmul.f32 0.03125, %v1295_v48 }
 0x6ea   : > { %v1311_v52 = vmul.f32 %v1299_v49, %v1299_v49  ;;  %v1315_v61 = vsub.f32 %v1291_v40, %v1299_v49 }
 0x6eb   : > { %v1305_v50 = vpop.xlane.xlu0 %1304 }
 0x6ec   : > { %v1309_v53 = vmul.f32 0.03125, %v1305_v50 }
 0x6ee   : > { %v1313_v54 = vsub.f32 %v1309_v53, %v1311_v52 }
 0x6ef   : > { %v1308_v55 = vpop.xlane.xlu0 %1307 }
 0x6f0   : > { %v1317_v57 = vadd.f32 1e-05, %v1313_v54  ;;  %v1310_v58 = vmul.f32 0.03125, %v1308_v55 }
 0x6f2   : > { %1784 = vrsqrt.f32 %v1317_v57  ;;  %v1314_v59 = vsub.f32 %v1310_v58, %v1312_v56 }
 0x6f4   : > { %v1318_v60 = vadd.f32 1e-05, %v1314_v59 }
 0x6f6   : > { %1786 = vrsqrt.f32 %v1318_v60 }
 0x6ff   : > { %v1785_v62 = vpop.eup %1784 }
 0x700   : > { %v1321_v0 = vmul.f32 %v1785_v62, %v1315_v61 }
 0x702   : > { %v1330_v3 = vmul.f32 %v1635_v63, %v1321_v0 }
 0x703   : > { %v1787_v5 = vpop.eup %1786 }
 0x704   : > { %v1339_v6 = vadd.f32 %v1636_v1, %v1330_v3  ;;  %v1322_v4 = vmul.f32 %v1787_v5, %v1316_v2 }
 0x706   : > { %1341 = vst.msk [vmem:[#allocation2] sm:$0xff] %vm636_vm1, %v1339_v6  ;;  %v1331_v7 = vmul.f32 %v1635_v63, %v1322_v4  ;;  %1346 = sbr.rel (%p1637_p6) target bundleno = 2010 (0x7da), region = 80 }
 0x708   : > { %v1340_v8 = vadd.f32 %v1636_v1, %v1331_v7 }
 0x70a   : > { %1342 = vst.msk [vmem:[#allocation2 + $0x8] sm:$0xff] %vm636_vm1, %v1340_v8 }
 0x70b   : > { %v1350_v9 = vld [vmem:[%s2084_s11 + $0x18] sm:$0xff]  ;;  %v1349_v10 = vld [vmem:[%s2084_s11 + $0x10] sm:$0xff]  ;;  %1741 = vmatprep.mubr.msk.f32.mxu0 %vm636_vm1, %v1339_v6  ;;  %v1348_v11 = vld [vmem:[%s2084_s11 + $0x8] sm:$0xff]  ;;  %vm1439_vm5 = vcmask 523264  }
 0x70c   : > { %1733 = vmatprep.subr.mxu0 %v1350_v9  ;;  %v1347_v12 = vld [vmem:[%s2084_s11] sm:$0xff] }
 0x70d   : > { %1734 = vmatpush3.msra.mxu0 %v1350_v9  ;;  %v1638_v13 = vld [vmem:[%s2101_s26] ss:$0 sm:$0xff] }
 0x70e   : > { %1735 = vmatprep.subr.mxu0 %v1349_v10 }
 0x70f   : > { %1736 = vmatpush3.msra.mxu0 %v1349_v10 }
 0x710   : > { %1737 = vmatprep.subr.mxu0 %v1348_v11 }
 0x711   : > { %1738 = vmatpush3.msra.mxu0 %v1348_v11 }
 0x712   : > { %1739 = vmatprep.subr.mxu0 %v1347_v12 }
 0x713   : > { %1740 = vmatpush3.msra.mxu0 %v1347_v12 }
 0x714   : > { %1742 = vmatmul.mubr.msk.f32.vlgmr.msra.gmra.mxu0 %vm636_vm1, %v1340_v8 }
 0x7d4   : > { %v1743_v14 = vpop.f32.mrf.mxu0 }
 0x7d5   : > { %v1436_v15 = vadd.f32 %v1743_v14, %v1638_v13 }
 0x7d6   : > { %v1430_v16 = vpop.f32.mrf.mxu0 }
 0x7d7   : > { %1441 = vst.msk [vmem:[%s2102_s12 + $0x8] sm:$0xff] %vm1439_vm5, %v1436_v15  ;;  %v1431_v17 = vadd.f32 %v1638_v13, %v1430_v16 }
 0x7d9   : > { %1440 = vst.msk [vmem:[%s2102_s12] sm:$0xff] %vm1439_vm5, %v1431_v17 }
 0x7da PF: > { %s2103_s16 = sld [smem:[#allocation4_spill]] }
 0x7db   : > { %s2104_s25 = sld [smem:[#allocation3_spill]] }
 0x7dc   : > { %s2105_s26 = sld [smem:[#allocation5_spill]] }
 0x7e0   : > { %s23_s27 = sadd.s32 1, %s2103_s16  }
 0x7e1   : > { %p20_p7 = scmp.ge.s32.totalorder %s23_s27, 4  }
 0x7e3   :  { %22 = sbr.rel (!%p20_p7) target bundleno = 5 (0x5), region = 140 }

</bundles_post_ra>
